<compile_context>
chip_gen: v6e
topology: v6e:2x2x1
jax: 0.10.0
libtpu: 0.0.40
codegen_flags: <defaults>
</compile_context>

<pallas_src>
import math

import jax
import jax.numpy as jnp
from jax import lax
from jax.experimental import pallas as pl
from jax.experimental.pallas import tpu as pltpu

_MIB = 1024 * 1024


def _gelu_exact(x):
    # PyTorch nn.GELU() default: exact erf-based GELU (computed in f32).
    return 0.5 * x * (1.0 + lax.erf(x * (1.0 / math.sqrt(2.0))))


def _round_up(x, m):
    return ((x + m - 1) // m) * m


def _sublane_multiple(dtype):
    # Second-to-last-dim granularity: 8 (f32), 16 (bf16), 32 (int8/fp8).
    return max(8, 32 // jnp.dtype(dtype).itemsize)


def _vmem_capacity_bytes():
    try:
        return int(pltpu.get_tpu_info().vmem_capacity_bytes)
    except Exception:
        return 64 * _MIB  # conservative fallback (v7x-sized VMEM)


def _default_budgets():
    """(weight_vmem_budget, vmem_limit_bytes) sized for the current chip."""
    cap = _vmem_capacity_bytes()
    if cap >= 96 * _MIB:            # v5e / v6e: 128 MiB physical VMEM
        return 84 * _MIB, 100 * _MIB
    return 36 * _MIB, 50 * _MIB     # v7x: 64 MiB per TensorCore


def _choose_hidden_chunk(dim, hidden, w_itemsize, weight_vmem_budget):
    """Hidden (K) chunk size.

    * If a single copy of W1+W2 fits the budget -> fully resident (nk == 1);
      the resident path single-buffers the weights (pl.Buffered(1)).
    * Otherwise pick the LARGEST 128-aligned divisor of `hidden` whose
      double-buffered W1/W2 chunks fit the budget (chunks are streamed, so
      they keep 2-deep pipelining).
    """
    single_copy = 2 * dim * hidden * w_itemsize
    if single_copy <= weight_vmem_budget or hidden % 128 != 0:
        # Fully resident, or hidden can't be split into 128-aligned chunks
        # (W1's block lane dim must be a multiple of 128 or the full extent).
        return hidden
    for lanes in range(hidden // 128, 0, -1):
        th = lanes * 128
        if hidden % th == 0 and 2 * 2 * dim * th * w_itemsize <= weight_vmem_budget:
            return th
    return 128


def _ffn_kernel_resident(x_ref, w1_ref, b1_ref, w2_ref, b2_ref, o_ref):
    """nk == 1 fast path: weights fully resident; output written directly
    (no f32 accumulator round trip through VMEM)."""
    h = jnp.dot(x_ref[...], w1_ref[...], preferred_element_type=jnp.float32)
    h = _gelu_exact(h + b1_ref[...].astype(jnp.float32))
    out = jnp.dot(h.astype(w2_ref.dtype), w2_ref[...],
                  preferred_element_type=jnp.float32)
    o_ref[...] = (out + b2_ref[...].astype(jnp.float32)).astype(o_ref.dtype)


def _ffn_kernel_chunked(x_ref, w1_ref, b1_ref, w2_ref, b2_ref, o_ref, acc_ref):
    """nk > 1 path: hidden is chunked along the trailing 'arbitrary' grid axis;
    partial products accumulate in an f32 VMEM scratch tile."""
    k = pl.program_id(1)

    @pl.when(k == 0)
    def _init():
        acc_ref[...] = jnp.zeros_like(acc_ref)

    h = jnp.dot(x_ref[...], w1_ref[...], preferred_element_type=jnp.float32)
    h = _gelu_exact(h + b1_ref[...].astype(jnp.float32))
    acc_ref[...] += jnp.dot(h.astype(w2_ref.dtype), w2_ref[...],
                            preferred_element_type=jnp.float32)

    @pl.when(k == pl.num_programs(1) - 1)
    def _finalize():
        o_ref[...] = (acc_ref[...] + b2_ref[...].astype(jnp.float32)
                      ).astype(o_ref.dtype)


def feedforward(x, w1, b1, w2, b2, *, tm=None,
                vmem_limit_bytes=None, weight_vmem_budget=None):
    """x: (batch, seq, dim). w1: (dim, hidden), b1: (hidden,),
    w2: (hidden, dim), b2: (dim,).  Weights are stored as
    (in_features, out_features) == transpose of PyTorch nn.Linear.weight."""
    batch, seq, dim = x.shape
    hidden = w1.shape[1]
    M = batch * seq

    default_wbudget, default_limit = _default_budgets()
    if weight_vmem_budget is None:
        weight_vmem_budget = default_wbudget
    if vmem_limit_bytes is None:
        vmem_limit_bytes = default_limit

    w_itemsize = jnp.dtype(w1.dtype).itemsize
    x_itemsize = jnp.dtype(x.dtype).itemsize

    # ---- hidden (K) chunking ------------------------------------------------
    th = _choose_hidden_chunk(dim, hidden, w_itemsize, weight_vmem_budget)
    nk = hidden // th  # hidden % th == 0 by construction

    # ---- row-tile (M) selection --------------------------------------------
    sub = _sublane_multiple(x.dtype)
    if tm is None:
        if nk == 1:
            tm = 256
        else:
            # Chunked path re-streams all weights once per M tile: use a large
            # tile so arithmetic intensity stays above the HBM roofline.
            tm = 1024 if x_itemsize <= 2 else 512
    tm = _round_up(max(tm, sub), sub)
    # Keep >= 2 M tiles whenever M allows it, so the 'parallel' M axis can
    # shard across v7x's two TensorCores.
    tm = min(tm, _round_up(max((M + 1) // 2, sub), sub))
    # Clamp tm so the (double-buffered) x/out tiles plus the f32 accumulator
    # fit next to the resident weights within vmem_limit_bytes.
    if nk == 1:
        resident_w = 2 * dim * hidden * w_itemsize           # single copy
    else:
        resident_w = 2 * 2 * dim * th * w_itemsize           # 2x-buffered chunks
    resident_w += 2 * 2 * (hidden + dim) * w_itemsize        # biases (tiny)
    headroom = vmem_limit_bytes - resident_w - 2 * _MIB
    per_row = dim * 4 * x_itemsize + (dim * 4 if nk > 1 else 0)
    tm_vmem = max(sub, (max(headroom, 0) // max(per_row, 1)) // sub * sub)
    tm = max(sub, min(tm, tm_vmem))

    M_pad = _round_up(M, tm)
    n_m_tiles = M_pad // tm

    x2d = x.reshape(M, dim)
    if M_pad != M:
        x2d = jnp.pad(x2d, ((0, M_pad - M), (0, 0)))

    b1_2d = b1.reshape(1, hidden)
    b2_2d = b2.reshape(1, dim)

    # ---- advisory cost estimate --------------------------------------------
    weight_reads = 1 if nk == 1 else n_m_tiles  # chunked path re-reads weights per M tile
    bytes_accessed = int(
        M_pad * dim * x_itemsize * 2                               # x in + out
        + weight_reads * (2 * dim * hidden) * w_itemsize           # W1 + W2
        + (hidden + dim) * jnp.dtype(b1.dtype).itemsize)           # biases
    cost = pl.CostEstimate(
        flops=int(4 * M_pad * dim * hidden),
        transcendentals=int(M_pad * hidden),   # ~one erf eval per hidden activation
        bytes_accessed=bytes_accessed)

    mosaic = pltpu.CompilerParams(
        dimension_semantics=(("parallel",) if nk == 1
                             else ("parallel", "arbitrary")),
        vmem_limit_bytes=int(vmem_limit_bytes))

    if nk == 1:
        def launch(single_buffer_weights):
            if single_buffer_weights:
                # Constant-index weight/bias blocks need no prefetch overlap:
                # single buffering halves their footprint (matters on v7x).
                kw = {"pipeline_mode": pl.Buffered(1)}
            else:
                kw = {}
            pspec = lambda shape: pl.BlockSpec(shape, lambda i: (0, 0), **kw)
            return pl.pallas_call(
                _ffn_kernel_resident,
                out_shape=jax.ShapeDtypeStruct((M_pad, dim), x.dtype),
                grid_spec=pltpu.PrefetchScalarGridSpec(
                    num_scalar_prefetch=0,
                    grid=(n_m_tiles,),
                    in_specs=[
                        pl.BlockSpec((tm, dim), lambda i: (i, 0)),   # x row tile
                        pspec((dim, hidden)),                        # W1 (resident)
                        pspec((1, hidden)),                          # b1
                        pspec((hidden, dim)),                        # W2 (resident)
                        pspec((1, dim)),                             # b2
                    ],
                    out_specs=pl.BlockSpec((tm, dim), lambda i: (i, 0)),
                ),
                compiler_params=mosaic,
                cost_estimate=cost,
            )(x2d, w1, b1_2d, w2, b2_2d)

        try:
            out2d = launch(True)
        except Exception:
            out2d = launch(False)   # fallback if Buffered(1) is rejected
    else:
        out2d = pl.pallas_call(
            _ffn_kernel_chunked,
            out_shape=jax.ShapeDtypeStruct((M_pad, dim), x.dtype),
            grid_spec=pltpu.PrefetchScalarGridSpec(
                num_scalar_prefetch=0,
                grid=(n_m_tiles, nk),                            # reduction axis last
                in_specs=[
                    pl.BlockSpec((tm, dim), lambda i, k: (i, 0)),   # x row tile
                    pl.BlockSpec((dim, th), lambda i, k: (0, k)),   # W1 chunk
                    pl.BlockSpec((1, th), lambda i, k: (0, k)),     # b1 chunk
                    pl.BlockSpec((th, dim), lambda i, k: (k, 0)),   # W2 chunk
                    pl.BlockSpec((1, dim), lambda i, k: (0, 0)),    # b2
                ],
                out_specs=pl.BlockSpec((tm, dim), lambda i, k: (i, 0)),
                scratch_shapes=[pltpu.VMEM((tm, dim), jnp.float32)],  # f32 acc
            ),
            compiler_params=mosaic,
            cost_estimate=cost,
        )(x2d, w1, b1_2d, w2, b2_2d)

    if M_pad != M:
        out2d = out2d[:M]
    return out2d.reshape(batch, seq, dim)


def init_params(key, dim, hidden_dim, dtype=jnp.float32):
    """Deterministic init mimicking nn.Linear (uniform +-1/sqrt(fan_in))."""
    k1, k2, k3, k4 = jax.random.split(key, 4)
    bound1 = 1.0 / math.sqrt(dim)
    bound2 = 1.0 / math.sqrt(hidden_dim)
    w1 = jax.random.uniform(k1, (dim, hidden_dim), dtype, -bound1, bound1)
    b1 = jax.random.uniform(k2, (hidden_dim,), dtype, -bound1, bound1)
    w2 = jax.random.uniform(k3, (hidden_dim, dim), dtype, -bound2, bound2)
    b2 = jax.random.uniform(k4, (dim,), dtype, -bound2, bound2)
    return w1, b1, w2, b2


def feedforward_ref(x, w1, b1, w2, b2):
    h = jnp.dot(x.astype(jnp.float32), w1.astype(jnp.float32)) + b1.astype(jnp.float32)
    h = _gelu_exact(h)
    out = jnp.dot(h, w2.astype(jnp.float32)) + b2.astype(jnp.float32)
    return out.astype(x.dtype)


if __name__ == "__main__":
    key = jax.random.PRNGKey(0)
    kx, kp, kx2, kp2, kx3, kp3 = jax.random.split(key, 6)

    # Case 1: small f32 shapes -> nk==1 resident fast path (weights single-buffered).
    batch, seq, dim, hidden_dim = 2, 8, 32, 64
    x = jax.random.normal(kx, (batch, seq, dim), dtype=jnp.float32)
    w1, b1, w2, b2 = init_params(kp, dim, hidden_dim)
    out = jax.block_until_ready(feedforward(x, w1, b1, w2, b2))
    ref = feedforward_ref(x, w1, b1, w2, b2)
    assert out.shape == (batch, seq, dim)
    assert jnp.allclose(out, ref, atol=1e-4, rtol=1e-5), "case1 mismatch"

    # Case 2: exercises M-padding (batch*seq not a tile multiple) and the
    # hidden-chunked reduction path (tiny weight budget forces nk > 1).
    batch2, seq2, dim2, hidden2 = 3, 5, 128, 256
    x2 = jax.random.normal(kx2, (batch2, seq2, dim2), dtype=jnp.float32)
    w1b, b1b, w2b, b2b = init_params(kp2, dim2, hidden2)
    out2 = jax.block_until_ready(
        feedforward(x2, w1b, b1b, w2b, b2b, tm=64,
                    weight_vmem_budget=128 * 1024))
    ref2 = feedforward_ref(x2, w1b, b1b, w2b, b2b)
    assert out2.shape == (batch2, seq2, dim2)
    assert jnp.allclose(out2, ref2, atol=1e-4, rtol=1e-5), "case2 mismatch"

    # Case 3: bf16 operands (MXU native dtype, f32 accumulation) with a
    # looser tolerance against the f32 reference.
    batch3, seq3, dim3, hidden3 = 2, 8, 128, 256
    x3 = jax.random.normal(kx3, (batch3, seq3, dim3), dtype=jnp.bfloat16)
    w1c, b1c, w2c, b2c = init_params(kp3, dim3, hidden3, dtype=jnp.bfloat16)
    out3 = jax.block_until_ready(feedforward(x3, w1c, b1c, w2c, b2c))
    ref3 = feedforward_ref(x3, w1c, b1c, w2c, b2c)
    assert out3.shape == (batch3, seq3, dim3)
    assert jnp.allclose(out3.astype(jnp.float32), ref3.astype(jnp.float32),
                        atol=5e-2, rtol=5e-2), "case3 (bf16) mismatch"

    print("KERNEL_OK")
</pallas_src>

<mosaic_0001>
module attributes {stable_mosaic.version = 11 : i64} {
  func.func @_ffn_kernel_resident(%arg0: i32, %arg1: memref<8x32xf32, #tpu.memory_space<vmem>>, %arg2: memref<32x64xf32, #tpu.memory_space<vmem>>, %arg3: memref<1x64xf32, #tpu.memory_space<vmem>>, %arg4: memref<64x32xf32, #tpu.memory_space<vmem>>, %arg5: memref<1x32xf32, #tpu.memory_space<vmem>>, %arg6: memref<8x32xf32, #tpu.memory_space<vmem>>) attributes {dimension_semantics = [#tpu.dimension_semantics<parallel>], iteration_bounds = array<i64: 2>, scalar_prefetch = 0 : i64, scratch_operands = 0 : i64, tpu.core_type = #tpu.core_type<tc>, window_params = [{transform_indices = @transform_0, window_bounds = array<i64: 8, 32>}, {pipeline_mode = #tpu.pipeline_mode<synchronous>, transform_indices = @transform_1, window_bounds = array<i64: 32, 64>}, {pipeline_mode = #tpu.pipeline_mode<synchronous>, transform_indices = @transform_2, window_bounds = array<i64: 1, 64>}, {pipeline_mode = #tpu.pipeline_mode<synchronous>, transform_indices = @transform_3, window_bounds = array<i64: 64, 32>}, {pipeline_mode = #tpu.pipeline_mode<synchronous>, transform_indices = @transform_4, window_bounds = array<i64: 1, 32>}, {transform_indices = @transform_5, window_bounds = array<i64: 8, 32>}]} {
    %c0 = arith.constant 0 : index
    %c0_0 = arith.constant 0 : index
    %0 = vector.load %arg1[%c0, %c0_0] : memref<8x32xf32, #tpu.memory_space<vmem>>, vector<8x32xf32>
    %c0_1 = arith.constant 0 : index
    %c0_2 = arith.constant 0 : index
    %1 = vector.load %arg2[%c0_1, %c0_2] : memref<32x64xf32, #tpu.memory_space<vmem>>, vector<32x64xf32>
    %cst = arith.constant dense<0.000000e+00> : vector<8x64xf32>
    %2 = tpu.matmul %0, %1, %cst {dimension_numbers = #tpu.dot_dimension_numbers<[1], [0], [0], [1], [0, 0, 1, 1], [], []>} : vector<8x32xf32>, vector<32x64xf32>, vector<8x64xf32> -> vector<8x64xf32>
    %c0_3 = arith.constant 0 : index
    %c0_4 = arith.constant 0 : index
    %3 = vector.load %arg3[%c0_3, %c0_4] : memref<1x64xf32, #tpu.memory_space<vmem>>, vector<1x64xf32>
    %4 = vector.broadcast %3 : vector<1x64xf32> to vector<8x64xf32>
    %5 = arith.addf %2, %4 : vector<8x64xf32>
    %cst_5 = arith.constant 5.000000e-01 : f32
    %6 = vector.broadcast %cst_5 : f32 to vector<8x64xf32>
    %7 = arith.mulf %6, %5 : vector<8x64xf32>
    %cst_6 = arith.constant 0.707106769 : f32
    %8 = vector.broadcast %cst_6 : f32 to vector<8x64xf32>
    %9 = arith.mulf %5, %8 : vector<8x64xf32>
    %10 = math.erf %9 : vector<8x64xf32>
    %cst_7 = arith.constant 1.000000e+00 : f32
    %11 = vector.broadcast %cst_7 : f32 to vector<8x64xf32>
    %12 = arith.addf %11, %10 : vector<8x64xf32>
    %13 = arith.mulf %7, %12 : vector<8x64xf32>
    %c0_8 = arith.constant 0 : index
    %c0_9 = arith.constant 0 : index
    %14 = vector.load %arg4[%c0_8, %c0_9] : memref<64x32xf32, #tpu.memory_space<vmem>>, vector<64x32xf32>
    %cst_10 = arith.constant dense<0.000000e+00> : vector<8x32xf32>
    %15 = tpu.matmul %13, %14, %cst_10 {dimension_numbers = #tpu.dot_dimension_numbers<[1], [0], [0], [1], [0, 0, 1, 1], [], []>} : vector<8x64xf32>, vector<64x32xf32>, vector<8x32xf32> -> vector<8x32xf32>
    %c0_11 = arith.constant 0 : index
    %c0_12 = arith.constant 0 : index
    %16 = vector.load %arg5[%c0_11, %c0_12] : memref<1x32xf32, #tpu.memory_space<vmem>>, vector<1x32xf32>
    %17 = vector.broadcast %16 : vector<1x32xf32> to vector<8x32xf32>
    %18 = arith.addf %15, %17 : vector<8x32xf32>
    %c0_13 = arith.constant 0 : index
    %c0_14 = arith.constant 0 : index
    %19 = vector.load %arg6[%c0_13, %c0_14] : memref<8x32xf32, #tpu.memory_space<vmem>>, vector<8x32xf32>
    tpu.vector_store %arg6[%c0_13, %c0_14], %18 {strides = array<i32>} : memref<8x32xf32, #tpu.memory_space<vmem>>, vector<8x32xf32>,
    return
  }
  func.func @transform_0(%arg0: i32) -> (i32, i32) {
    %c0_i32 = arith.constant 0 : i32
    %c0_i32_0 = arith.constant 0 : i32
    return %arg0, %c0_i32 : i32, i32
  }
  func.func @transform_1(%arg0: i32) -> (i32, i32) {
    %c0_i32 = arith.constant 0 : i32
    %c0_i32_0 = arith.constant 0 : i32
    %c0_i32_1 = arith.constant 0 : i32
    return %c0_i32, %c0_i32_0 : i32, i32
  }
  func.func @transform_2(%arg0: i32) -> (i32, i32) {
    %c0_i32 = arith.constant 0 : i32
    %c0_i32_0 = arith.constant 0 : i32
    %c0_i32_1 = arith.constant 0 : i32
    return %c0_i32, %c0_i32_0 : i32, i32
  }
  func.func @transform_3(%arg0: i32) -> (i32, i32) {
    %c0_i32 = arith.constant 0 : i32
    %c0_i32_0 = arith.constant 0 : i32
    %c0_i32_1 = arith.constant 0 : i32
    return %c0_i32, %c0_i32_0 : i32, i32
  }
  func.func @transform_4(%arg0: i32) -> (i32, i32) {
    %c0_i32 = arith.constant 0 : i32
    %c0_i32_0 = arith.constant 0 : i32
    %c0_i32_1 = arith.constant 0 : i32
    return %c0_i32, %c0_i32_0 : i32, i32
  }
  func.func @transform_5(%arg0: i32) -> (i32, i32) {
    %c0_i32 = arith.constant 0 : i32
    %c0_i32_0 = arith.constant 0 : i32
    return %arg0, %c0_i32 : i32, i32
  }
}

module attributes {stable_mosaic.version = 11 : i64} {
  func.func @_ffn_kernel_resident(%arg0: i32, %arg1: memref<8x32xf32, #tpu.memory_space<vmem>>, %arg2: memref<32x64xf32, #tpu.memory_space<vmem>>, %arg3: memref<1x64xf32, #tpu.memory_space<vmem>>, %arg4: memref<64x32xf32, #tpu.memory_space<vmem>>, %arg5: memref<1x32xf32, #tpu.memory_space<vmem>>, %arg6: memref<8x32xf32, #tpu.memory_space<vmem>>) attributes {dimension_semantics = [#tpu.dimension_semantics<parallel>], iteration_bounds = array<i64: 2>, scalar_prefetch = 0 : i64, scratch_operands = 0 : i64, tpu.core_type = #tpu.core_type<tc>, window_params = [{transform_indices = @transform_0, window_bounds = array<i64: 8, 32>}, {pipeline_mode = #tpu.pipeline_mode<synchronous>, transform_indices = @transform_1, window_bounds = array<i64: 32, 64>}, {pipeline_mode = #tpu.pipeline_mode<synchronous>, transform_indices = @transform_2, window_bounds = array<i64: 1, 64>}, {pipeline_mode = #tpu.pipeline_mode<synchronous>, transform_indices = @transform_3, window_bounds = array<i64: 64, 32>}, {pipeline_mode = #tpu.pipeline_mode<synchronous>, transform_indices = @transform_4, window_bounds = array<i64: 1, 32>}, {transform_indices = @transform_5, window_bounds = array<i64: 8, 32>}]} {
    %c0 = arith.constant 0 : index
    %c0_0 = arith.constant 0 : index
    %0 = vector.load %arg1[%c0, %c0_0] : memref<8x32xf32, #tpu.memory_space<vmem>>, vector<8x32xf32>
    %c0_1 = arith.constant 0 : index
    %c0_2 = arith.constant 0 : index
    %1 = vector.load %arg2[%c0_1, %c0_2] : memref<32x64xf32, #tpu.memory_space<vmem>>, vector<32x64xf32>
    %cst = arith.constant dense<0.000000e+00> : vector<8x64xf32>
    %2 = tpu.matmul %0, %1, %cst {dimension_numbers = #tpu.dot_dimension_numbers<[1], [0], [0], [1], [0, 0, 1, 1], [], []>} : vector<8x32xf32>, vector<32x64xf32>, vector<8x64xf32> -> vector<8x64xf32>
    %c0_3 = arith.constant 0 : index
    %c0_4 = arith.constant 0 : index
    %3 = vector.load %arg3[%c0_3, %c0_4] : memref<1x64xf32, #tpu.memory_space<vmem>>, vector<1x64xf32>
    %4 = vector.broadcast %3 : vector<1x64xf32> to vector<8x64xf32>
    %5 = arith.addf %2, %4 : vector<8x64xf32>
    %cst_5 = arith.constant 5.000000e-01 : f32
    %6 = vector.broadcast %cst_5 : f32 to vector<8x64xf32>
    %7 = arith.mulf %6, %5 : vector<8x64xf32>
    %cst_6 = arith.constant 0.707106769 : f32
    %8 = vector.broadcast %cst_6 : f32 to vector<8x64xf32>
    %9 = arith.mulf %5, %8 : vector<8x64xf32>
    %10 = math.erf %9 : vector<8x64xf32>
    %cst_7 = arith.constant 1.000000e+00 : f32
    %11 = vector.broadcast %cst_7 : f32 to vector<8x64xf32>
    %12 = arith.addf %11, %10 : vector<8x64xf32>
    %13 = arith.mulf %7, %12 : vector<8x64xf32>
    %c0_8 = arith.constant 0 : index
    %c0_9 = arith.constant 0 : index
    %14 = vector.load %arg4[%c0_8, %c0_9] : memref<64x32xf32, #tpu.memory_space<vmem>>, vector<64x32xf32>
    %cst_10 = arith.constant dense<0.000000e+00> : vector<8x32xf32>
    %15 = tpu.matmul %13, %14, %cst_10 {dimension_numbers = #tpu.dot_dimension_numbers<[1], [0], [0], [1], [0, 0, 1, 1], [], []>} : vector<8x64xf32>, vector<64x32xf32>, vector<8x32xf32> -> vector<8x32xf32>
    %c0_11 = arith.constant 0 : index
    %c0_12 = arith.constant 0 : index
    %16 = vector.load %arg5[%c0_11, %c0_12] : memref<1x32xf32, #tpu.memory_space<vmem>>, vector<1x32xf32>
    %17 = vector.broadcast %16 : vector<1x32xf32> to vector<8x32xf32>
    %18 = arith.addf %15, %17 : vector<8x32xf32>
    %c0_13 = arith.constant 0 : index
    %c0_14 = arith.constant 0 : index
    %19 = vector.load %arg6[%c0_13, %c0_14] : memref<8x32xf32, #tpu.memory_space<vmem>>, vector<8x32xf32>
    tpu.vector_store %arg6[%c0_13, %c0_14], %18 {strides = array<i32>} : memref<8x32xf32, #tpu.memory_space<vmem>>, vector<8x32xf32>,
    return
  }
  func.func @transform_0(%arg0: i32) -> (i32, i32) {
    %c0_i32 = arith.constant 0 : i32
    %c0_i32_0 = arith.constant 0 : i32
    return %arg0, %c0_i32 : i32, i32
  }
  func.func @transform_1(%arg0: i32) -> (i32, i32) {
    %c0_i32 = arith.constant 0 : i32
    %c0_i32_0 = arith.constant 0 : i32
    %c0_i32_1 = arith.constant 0 : i32
    return %c0_i32, %c0_i32_0 : i32, i32
  }
  func.func @transform_2(%arg0: i32) -> (i32, i32) {
    %c0_i32 = arith.constant 0 : i32
    %c0_i32_0 = arith.constant 0 : i32
    %c0_i32_1 = arith.constant 0 : i32
    return %c0_i32, %c0_i32_0 : i32, i32
  }
  func.func @transform_3(%arg0: i32) -> (i32, i32) {
    %c0_i32 = arith.constant 0 : i32
    %c0_i32_0 = arith.constant 0 : i32
    %c0_i32_1 = arith.constant 0 : i32
    return %c0_i32, %c0_i32_0 : i32, i32
  }
  func.func @transform_4(%arg0: i32) -> (i32, i32) {
    %c0_i32 = arith.constant 0 : i32
    %c0_i32_0 = arith.constant 0 : i32
    %c0_i32_1 = arith.constant 0 : i32
    return %c0_i32, %c0_i32_0 : i32, i32
  }
  func.func @transform_5(%arg0: i32) -> (i32, i32) {
    %c0_i32 = arith.constant 0 : i32
    %c0_i32_0 = arith.constant 0 : i32
    return %arg0, %c0_i32 : i32, i32
  }
}

</mosaic_0001>

<bundles_post_ra>
// kernel: tpu_custom_call.1
= control target key start
LH: loop header
LB: loop body
LE: loop exit
PB: predicated region body
PF: predicated region fallthrough
CT: control target
= control target key end

     0   :  { %10 = vsyncpa [#allocation3], 0  ;;  %s807_s0 = inlined_call_operand.vmem [shape: f32[16,32], index: 0, kind: input, shape index: {}]   ;;  %s808_s1 = inlined_call_operand.vmem [shape: f32[32,64], index: 1, kind: input, shape index: {}]   ;;  %s809_s2 = inlined_call_operand.vmem [shape: f32[1,64], index: 2, kind: input, shape index: {}]   ;;  %s810_s3 = inlined_call_operand.vmem [shape: f32[64,32], index: 3, kind: input, shape index: {}]   ;;  %s811_s4 = inlined_call_operand.vmem [shape: f32[1,32], index: 4, kind: input, shape index: {}]   ;;  %s812_s5 = inlined_call_operand.hbm [shape: f32[16,32], index: 5, kind: output, shape index: {}]  }
   0x1   :  { %12 = vsyncpa [#allocation3 + $0x1], 0  ;;  %s670_s18 = smov 0   ;;  %s672_s19 = smov 0  }
   0x2   :  { %s674_s20 = smov 0   ;;  %s676_s21 = smov 0  }
   0x3 LB: > { %s691_s22 = sadd.s32 4294967295, %s635_s21   ;;  %s474_s23 = sadd.s32 4294967294, %s635_s21   ;;  %s635_s21 = sphi %s676_s21, %s818_s21   ;;  %s631_s20 = sphi %s674_s20, %s817_s20   ;;  %s627_s19 = sphi %s672_s19, %s816_s19   ;;  %s623_s18 = sphi %s670_s18, %s815_s18  }
   0x4   : > { %s695_s24 = sadd.s32 1, %s635_s21   ;;  %s135_s25 = sadd.s32 1, %s631_s20 }
   0x5   : > { %s132_s26 = ssub.s32 %s635_s21, %s695_s24  ;;  %p145_p0 = scmp.ne.s32.totalorder %s631_s20, %s627_s19 }
   0x6   : > { %p133_p1 = scmp.eq.s32.totalorder %s132_s26, 0  ;;  %p146_p2 = scmp.eq.s32.totalorder %s691_s22, 1 }
   0x7   : > { %p151_p3 = scmp.ne.s32.totalorder %s627_s19, %s623_s18  ;;  %p152_p4 = scmp.eq.s32.totalorder %s474_s23, 1 }
   0x8   : > { %s706_s27 = scalar_select %p133_p1, %s631_s20, %s135_s25  }
   0x9   : > { %p708_p5 = por %p146_p2, %p145_p0  ;;  %p712_p6 = por %p152_p4, %p151_p3 }
   0xa   : > { %p477_p7 = scmp.ge.s32.totalorder %s635_s21, 1  ;;  %p189_p8 = scmp.lt.s32.totalorder %s635_s21, 3 }
   0xc   : > { %p190_p9 = pnand %p477_p7, %p189_p8 }
   0xd   : > { %p216_p10 = scmp.lt.s32.totalorder (!%p190_p9), %s691_s22, 1  ;;  %s213_s26 = sand.u32 (!%p190_p9), 1, %s627_s19  }
   0xe   : > { %193 = sbr.rel (%p190_p9) target bundleno = 451 (0x1c3), region = 40  ;;  %s478_s30 = sshll.u32 (!%p190_p9), %s213_s26, 3 }
   0xf   : > { %s485_s8 = sshll.u32 (!%p190_p9), %s691_s22, 7  ;;  %s402_s14 = scalar_lea.sflag (!%p190_p9), [#allocation3], %s213_s26 }
  0x10   : > { %s771_s13 = scalar_lea.hbm (!%p190_p9), %s812_s5, %s485_s8 }
  0x13   : > { %v224_v0 = vld [vmem:[%s808_s1 + $0x18] sm:$0xff]  ;;  %v637_v1 = vmov 0.0   ;;  %v223_v2 = vld [vmem:[%s808_s1 + $0x10] sm:$0xff]  ;;  %vm638_vm0 = vmmov 0   ;;  %s217_s9 = scalar_select %p216_p10, %s691_s22, 1  ;;  %v222_v3 = vld [vmem:[%s808_s1 + $0x8] sm:$0xff] }
  0x14   : > { %502 = vmatprep.subr.mxu0 %v637_v1  ;;  %510 = vmatprep.mubr.msk.f32.mxu0 %vm638_vm0, %v637_v1  ;;  %v221_v4 = vld [vmem:[%s808_s1] sm:$0xff]  ;;  %vm232_vm1 = vcmask 261120   ;;  %v318_v6 = vld [vmem:[%s810_s3 + $0x38] sm:$0xff]  ;;  %v317_v7 = vld [vmem:[%s810_s3 + $0x30] sm:$0xff]  ;;  %vm326_vm2 = vcmask 523264   ;;  %s639_s22 = smov [#allocation2]  }
  0x15   : > { %503 = vmatpush3.msra.mxu0 %v224_v0  ;;  %513 = vmatprep.subr.mxu1 %v637_v1  ;;  %s479_s12 = sshll.u32 %s217_s9, 3  ;;  %v316_v8 = vld [vmem:[%s810_s3 + $0x28] sm:$0xff]  ;;  %v315_v9 = vld [vmem:[%s810_s3 + $0x20] sm:$0xff]  ;;  %v314_v10 = vld [vmem:[%s810_s3 + $0x18] sm:$0xff]  ;;  %s215_s9 = scalar_lea.vmem [#allocation2], %s478_s30 }
  0x16   : > { %504 = vmatprep.subr.mxu0 %v637_v1  ;;  %529 = vmatprep.mubr.msk.f32.mxu1 %vm638_vm0, %v637_v1  ;;  %s219_s17 = scalar_lea.vmem %s807_s0, %s479_s12  ;;  %v313_v11 = vld [vmem:[%s810_s3 + $0x10] sm:$0xff]  ;;  %v312_v12 = vld [vmem:[%s810_s3 + $0x8] sm:$0xff]  ;;  %v311_v13 = vld [vmem:[%s810_s3] sm:$0xff]  ;;  %s415_s10 = sshll.u32 %s215_s9, 4  ;;  %s416_s10 = int_to_ptr.vmem [resolvable:$true] %s415_s10 }
  0x17   : > { %505 = vmatpush3.msra.mxu0 %v223_v2  ;;  %v220_v5 = vld [vmem:[%s219_s17] sm:$0xff]  ;;  %514 = vmatpush3.msra.mxu1 %v318_v6  ;;  %s575_s15 = scalar_lea.vmem %s416_s10, 128  ;;  %s579_s16 = sshll.u32 %s639_s22, 4  ;;  %s580_s16 = int_to_ptr.vmem [resolvable:$false] %s579_s16 }
  0x18   : > { %506 = vmatprep.subr.mxu0 %v637_v1  ;;  %515 = vmatprep.subr.mxu1 %v637_v1  ;;  %v480_v14 = vld [vmem:[%s809_s2] ss:$0 sm:$0xff]  ;;  %p576_p11 = scmp.ne.s32.totalorder %s416_s10, %s575_s15  ;;  %s581_s17 = scalar_lea.vmem %s580_s16, 256 }
  0x19   : > { %507 = vmatpush3.msra.mxu0 %v222_v3  ;;  %516 = vmatpush3.msra.mxu1 %v317_v7  ;;  %v482_v23 = vld [vmem:[%s811_s4] ss:$0 sm:$0xff]  ;;  %p582_p0 = scmp.lt.s32.totalorder %s416_s10, %s580_s16  ;;  %p583_p1 = scmp.lt.s32.totalorder %s581_s17, %s575_s15 }
  0x1a   : > { %508 = vmatprep.subr.mxu0 %v637_v1  ;;  %517 = vmatprep.subr.mxu1 %v637_v1  ;;  %p577_p12 = pnand %p576_p11, %p708_p5 }
  0x1b   : > { %509 = vmatpush3.msra.mxu0 %v221_v4  ;;  %518 = vmatpush3.msra.mxu1 %v316_v8  ;;  %p584_p2 = por %p583_p1, %p582_p0 }
  0x1c   : > { %511 = vmatmul.mubr.msk.f32.vlgmr.msra.gmra.mxu0 %vm232_vm1, %v220_v5  ;;  %519 = vmatprep.subr.mxu1 %v637_v1  ;;  %p578_p13 = pneg %p577_p12 }
  0x1d   : > { %520 = vmatpush3.msra.mxu1 %v315_v9 }
  0x1e   : > { %521 = vmatprep.subr.mxu1 %v637_v1  ;;  %p585_p3 = pnand %p584_p2, %p578_p13 }
  0x1f   : > { %522 = vmatpush3.msra.mxu1 %v314_v10 }
  0x20   : > { %523 = vmatprep.subr.mxu1 %v637_v1 }
  0x21   : > { %524 = vmatpush3.msra.mxu1 %v313_v11 }
  0x22   : > { %525 = vmatprep.subr.mxu1 %v637_v1 }
  0x23   : > { %526 = vmatpush3.msra.mxu1 %v312_v12 }
  0x24   : > { %527 = vmatprep.subr.mxu1 %v637_v1 }
  0x25   : > { %528 = vmatpush3.msra.mxu1 %v311_v13 }
  0xdc   : > { %v302_v15 = vpop.f32.mrf.mxu0 }
  0xdd   : > { %v303_v16 = vadd.f32 %v480_v14, %v302_v15 }
  0xde   : > { %v512_v17 = vpop.f32.mrf.mxu0 }
  0xdf   : > { %v307_v18 = vmul.f32 0.70710677, %v303_v16  ;;  %v306_v20 = vmul.f32 0.5, %v303_v16 }
  0xe1   : > { %573 = verf.f32 %v307_v18 }
  0xee   : > { %v574_v19 = vpop.eup %573 }
  0xef   : > { %v309_v21 = vadd.f32 1.0, %v574_v19 }
  0xf1   : > { %v310_v22 = vmul.f32 %v309_v21, %v306_v20 }
  0xf3   : > { %530 = vmatmul.mubr.msk.f32.vlgmr.msra.gmra.mxu1 %vm326_vm2, %v310_v22 }
 0x1b3   : > { %v396_v24 = vpop.f32.mrf.mxu1 }
 0x1b4   : > { %v397_v25 = vadd.f32 %v482_v23, %v396_v24 }
 0x1b5   : > { %v531_v26 = vpop.f32.mrf.mxu1 }
 0x1b6   : > { %400 = vst.msk [vmem:[%s215_s9] sm:$0xff] %vm232_vm1, %v397_v25 }
 0x1b7   : > { %588 = shalt.err (!%p585_p3)
}
 0x1b8   : > { %s589_s23 = scalar_lea.hbm %s771_s13, 128  ;;  %s593_s30 = scalar_lea.hbm %s812_s5, 256 }
 0x1b9   : > { %p590_p4 = scmp.ne.s32.totalorder %s771_s13, %s589_s23  ;;  %p594_p9 = scmp.lt.s32.totalorder %s771_s13, %s812_s5 }
 0x1ba   : > { %p595_p10 = scmp.lt.s32.totalorder %s593_s30, %s589_s23 }
 0x1bb   : > { %p591_p7 = pnand %p590_p4, %p708_p5 }
 0x1bc   : > { %p596_p11 = por %p595_p10, %p594_p9 }
 0x1bd   : > { %p592_p8 = pneg %p591_p7 }
 0x1bf   : > { %p597_p12 = pnand %p596_p11, %p592_p8 }
 0x1c1   : > { %600 = shalt.err (!%p597_p12)
}
 0x1c2   : > { %532 = dma.vmem_to_hbm [thread:$0]  (%p708_p5), %s416_s10, 128, %s771_s13, %s402_s14  }
 0x1c3 PF: > { %p538_p13 = scmp.ge.s32.totalorder %s635_s21, 2  ;;  %s427_s8 = sand.u32 1, %s623_s18  }
 0x1c4   : > { %s428_s9 = scalar_lea.sflag [#allocation3], %s427_s8 }
 0x1c5   : > { %p535_p0 = pnand %p538_p13, %p712_p6 }
 0x1c7   : > { %p536_p1 = pneg %p535_p0 }
 0x1c9   : > { %618 = dma.done.wait (%p536_p1), %s428_s9, 128  }
 0x1ca   : > { %620 = vsyncadd (%p536_p1), %s428_s9, 4294967168  ;;  %p15_p2 = scmp.ge.s32.totalorder %s695_s24, 4   ;;  %s815_s18 = smov %s627_s19 }
 0x1cb   : > { %s816_s19 = smov %s631_s20  ;;  %s817_s20 = smov %s706_s27 }
 0x1cc   : > { %s818_s21 = smov %s695_s24  ;;  %17 = sbr.rel (!%p15_p2) target bundleno = 3 (0x3), region = 75 }
 0x1d1   :  { %433 = vsyncpa [#allocation3], 1 }
 0x1d2   :  { %435 = vsyncpa [#allocation3 + $0x1], 1 }

// kernel: tpu_custom_call.1
= control target key start
LH: loop header
LB: loop body
LE: loop exit
PB: predicated region body
PF: predicated region fallthrough
CT: control target
= control target key end

     0   :  { %10 = vsyncpa [#allocation3], 0  ;;  %s807_s0 = inlined_call_operand.vmem [shape: f32[16,32], index: 0, kind: input, shape index: {}]   ;;  %s808_s1 = inlined_call_operand.vmem [shape: f32[32,64], index: 1, kind: input, shape index: {}]   ;;  %s809_s2 = inlined_call_operand.vmem [shape: f32[1,64], index: 2, kind: input, shape index: {}]   ;;  %s810_s3 = inlined_call_operand.vmem [shape: f32[64,32], index: 3, kind: input, shape index: {}]   ;;  %s811_s4 = inlined_call_operand.vmem [shape: f32[1,32], index: 4, kind: input, shape index: {}]   ;;  %s812_s5 = inlined_call_operand.hbm [shape: f32[16,32], index: 5, kind: output, shape index: {}]  }
   0x1   :  { %12 = vsyncpa [#allocation3 + $0x1], 0  ;;  %s670_s18 = smov 0   ;;  %s672_s19 = smov 0  }
   0x2   :  { %s674_s20 = smov 0   ;;  %s676_s21 = smov 0  }
   0x3 LB: > { %s691_s22 = sadd.s32 4294967295, %s635_s21   ;;  %s474_s23 = sadd.s32 4294967294, %s635_s21   ;;  %s635_s21 = sphi %s676_s21, %s818_s21   ;;  %s631_s20 = sphi %s674_s20, %s817_s20   ;;  %s627_s19 = sphi %s672_s19, %s816_s19   ;;  %s623_s18 = sphi %s670_s18, %s815_s18  }
   0x4   : > { %s695_s24 = sadd.s32 1, %s635_s21   ;;  %s135_s25 = sadd.s32 1, %s631_s20 }
   0x5   : > { %s132_s26 = ssub.s32 %s635_s21, %s695_s24  ;;  %p145_p0 = scmp.ne.s32.totalorder %s631_s20, %s627_s19 }
   0x6   : > { %p133_p1 = scmp.eq.s32.totalorder %s132_s26, 0  ;;  %p146_p2 = scmp.eq.s32.totalorder %s691_s22, 1 }
   0x7   : > { %p151_p3 = scmp.ne.s32.totalorder %s627_s19, %s623_s18  ;;  %p152_p4 = scmp.eq.s32.totalorder %s474_s23, 1 }
   0x8   : > { %s706_s27 = scalar_select %p133_p1, %s631_s20, %s135_s25  }
   0x9   : > { %p708_p5 = por %p146_p2, %p145_p0  ;;  %p712_p6 = por %p152_p4, %p151_p3 }
   0xa   : > { %p477_p7 = scmp.ge.s32.totalorder %s635_s21, 1  ;;  %p189_p8 = scmp.lt.s32.totalorder %s635_s21, 3 }
   0xc   : > { %p190_p9 = pnand %p477_p7, %p189_p8 }
   0xd   : > { %p216_p10 = scmp.lt.s32.totalorder (!%p190_p9), %s691_s22, 1  ;;  %s213_s26 = sand.u32 (!%p190_p9), 1, %s627_s19  }
   0xe   : > { %193 = sbr.rel (%p190_p9) target bundleno = 451 (0x1c3), region = 40  ;;  %s478_s30 = sshll.u32 (!%p190_p9), %s213_s26, 3 }
   0xf   : > { %s485_s8 = sshll.u32 (!%p190_p9), %s691_s22, 7  ;;  %s402_s14 = scalar_lea.sflag (!%p190_p9), [#allocation3], %s213_s26 }
  0x10   : > { %s771_s13 = scalar_lea.hbm (!%p190_p9), %s812_s5, %s485_s8 }
  0x13   : > { %v224_v0 = vld [vmem:[%s808_s1 + $0x18] sm:$0xff]  ;;  %v637_v1 = vmov 0.0   ;;  %v223_v2 = vld [vmem:[%s808_s1 + $0x10] sm:$0xff]  ;;  %vm638_vm0 = vmmov 0   ;;  %s217_s9 = scalar_select %p216_p10, %s691_s22, 1  ;;  %v222_v3 = vld [vmem:[%s808_s1 + $0x8] sm:$0xff] }
  0x14   : > { %502 = vmatprep.subr.mxu0 %v637_v1  ;;  %510 = vmatprep.mubr.msk.f32.mxu0 %vm638_vm0, %v637_v1  ;;  %v221_v4 = vld [vmem:[%s808_s1] sm:$0xff]  ;;  %vm232_vm1 = vcmask 261120   ;;  %v318_v6 = vld [vmem:[%s810_s3 + $0x38] sm:$0xff]  ;;  %v317_v7 = vld [vmem:[%s810_s3 + $0x30] sm:$0xff]  ;;  %vm326_vm2 = vcmask 523264   ;;  %s639_s22 = smov [#allocation2]  }
  0x15   : > { %503 = vmatpush3.msra.mxu0 %v224_v0  ;;  %513 = vmatprep.subr.mxu1 %v637_v1  ;;  %s479_s12 = sshll.u32 %s217_s9, 3  ;;  %v316_v8 = vld [vmem:[%s810_s3 + $0x28] sm:$0xff]  ;;  %v315_v9 = vld [vmem:[%s810_s3 + $0x20] sm:$0xff]  ;;  %v314_v10 = vld [vmem:[%s810_s3 + $0x18] sm:$0xff]  ;;  %s215_s9 = scalar_lea.vmem [#allocation2], %s478_s30 }
  0x16   : > { %504 = vmatprep.subr.mxu0 %v637_v1  ;;  %529 = vmatprep.mubr.msk.f32.mxu1 %vm638_vm0, %v637_v1  ;;  %s219_s17 = scalar_lea.vmem %s807_s0, %s479_s12  ;;  %v313_v11 = vld [vmem:[%s810_s3 + $0x10] sm:$0xff]  ;;  %v312_v12 = vld [vmem:[%s810_s3 + $0x8] sm:$0xff]  ;;  %v311_v13 = vld [vmem:[%s810_s3] sm:$0xff]  ;;  %s415_s10 = sshll.u32 %s215_s9, 4  ;;  %s416_s10 = int_to_ptr.vmem [resolvable:$true] %s415_s10 }
  0x17   : > { %505 = vmatpush3.msra.mxu0 %v223_v2  ;;  %v220_v5 = vld [vmem:[%s219_s17] sm:$0xff]  ;;  %514 = vmatpush3.msra.mxu1 %v318_v6  ;;  %s575_s15 = scalar_lea.vmem %s416_s10, 128  ;;  %s579_s16 = sshll.u32 %s639_s22, 4  ;;  %s580_s16 = int_to_ptr.vmem [resolvable:$false] %s579_s16 }
  0x18   : > { %506 = vmatprep.subr.mxu0 %v637_v1  ;;  %515 = vmatprep.subr.mxu1 %v637_v1  ;;  %v480_v14 = vld [vmem:[%s809_s2] ss:$0 sm:$0xff]  ;;  %p576_p11 = scmp.ne.s32.totalorder %s416_s10, %s575_s15  ;;  %s581_s17 = scalar_lea.vmem %s580_s16, 256 }
  0x19   : > { %507 = vmatpush3.msra.mxu0 %v222_v3  ;;  %516 = vmatpush3.msra.mxu1 %v317_v7  ;;  %v482_v23 = vld [vmem:[%s811_s4] ss:$0 sm:$0xff]  ;;  %p582_p0 = scmp.lt.s32.totalorder %s416_s10, %s580_s16  ;;  %p583_p1 = scmp.lt.s32.totalorder %s581_s17, %s575_s15 }
  0x1a   : > { %508 = vmatprep.subr.mxu0 %v637_v1  ;;  %517 = vmatprep.subr.mxu1 %v637_v1  ;;  %p577_p12 = pnand %p576_p11, %p708_p5 }
  0x1b   : > { %509 = vmatpush3.msra.mxu0 %v221_v4  ;;  %518 = vmatpush3.msra.mxu1 %v316_v8  ;;  %p584_p2 = por %p583_p1, %p582_p0 }
  0x1c   : > { %511 = vmatmul.mubr.msk.f32.vlgmr.msra.gmra.mxu0 %vm232_vm1, %v220_v5  ;;  %519 = vmatprep.subr.mxu1 %v637_v1  ;;  %p578_p13 = pneg %p577_p12 }
  0x1d   : > { %520 = vmatpush3.msra.mxu1 %v315_v9 }
  0x1e   : > { %521 = vmatprep.subr.mxu1 %v637_v1  ;;  %p585_p3 = pnand %p584_p2, %p578_p13 }
  0x1f   : > { %522 = vmatpush3.msra.mxu1 %v314_v10 }
  0x20   : > { %523 = vmatprep.subr.mxu1 %v637_v1 }
  0x21   : > { %524 = vmatpush3.msra.mxu1 %v313_v11 }
  0x22   : > { %525 = vmatprep.subr.mxu1 %v637_v1 }
  0x23   : > { %526 = vmatpush3.msra.mxu1 %v312_v12 }
  0x24   : > { %527 = vmatprep.subr.mxu1 %v637_v1 }
  0x25   : > { %528 = vmatpush3.msra.mxu1 %v311_v13 }
  0xdc   : > { %v302_v15 = vpop.f32.mrf.mxu0 }
  0xdd   : > { %v303_v16 = vadd.f32 %v480_v14, %v302_v15 }
  0xde   : > { %v512_v17 = vpop.f32.mrf.mxu0 }
  0xdf   : > { %v307_v18 = vmul.f32 0.70710677, %v303_v16  ;;  %v306_v20 = vmul.f32 0.5, %v303_v16 }
  0xe1   : > { %573 = verf.f32 %v307_v18 }
  0xee   : > { %v574_v19 = vpop.eup %573 }
  0xef   : > { %v309_v21 = vadd.f32 1.0, %v574_v19 }
  0xf1   : > { %v310_v22 = vmul.f32 %v309_v21, %v306_v20 }
  0xf3   : > { %530 = vmatmul.mubr.msk.f32.vlgmr.msra.gmra.mxu1 %vm326_vm2, %v310_v22 }
 0x1b3   : > { %v396_v24 = vpop.f32.mrf.mxu1 }
 0x1b4   : > { %v397_v25 = vadd.f32 %v482_v23, %v396_v24 }
 0x1b5   : > { %v531_v26 = vpop.f32.mrf.mxu1 }
 0x1b6   : > { %400 = vst.msk [vmem:[%s215_s9] sm:$0xff] %vm232_vm1, %v397_v25 }
 0x1b7   : > { %588 = shalt.err (!%p585_p3)
}
 0x1b8   : > { %s589_s23 = scalar_lea.hbm %s771_s13, 128  ;;  %s593_s30 = scalar_lea.hbm %s812_s5, 256 }
 0x1b9   : > { %p590_p4 = scmp.ne.s32.totalorder %s771_s13, %s589_s23  ;;  %p594_p9 = scmp.lt.s32.totalorder %s771_s13, %s812_s5 }
 0x1ba   : > { %p595_p10 = scmp.lt.s32.totalorder %s593_s30, %s589_s23 }
 0x1bb   : > { %p591_p7 = pnand %p590_p4, %p708_p5 }
 0x1bc   : > { %p596_p11 = por %p595_p10, %p594_p9 }
 0x1bd   : > { %p592_p8 = pneg %p591_p7 }
 0x1bf   : > { %p597_p12 = pnand %p596_p11, %p592_p8 }
 0x1c1   : > { %600 = shalt.err (!%p597_p12)
}
 0x1c2   : > { %532 = dma.vmem_to_hbm [thread:$0]  (%p708_p5), %s416_s10, 128, %s771_s13, %s402_s14  }
 0x1c3 PF: > { %p538_p13 = scmp.ge.s32.totalorder %s635_s21, 2  ;;  %s427_s8 = sand.u32 1, %s623_s18  }
 0x1c4   : > { %s428_s9 = scalar_lea.sflag [#allocation3], %s427_s8 }
 0x1c5   : > { %p535_p0 = pnand %p538_p13, %p712_p6 }
 0x1c7   : > { %p536_p1 = pneg %p535_p0 }
 0x1c9   : > { %618 = dma.done.wait (%p536_p1), %s428_s9, 128  }
 0x1ca   : > { %620 = vsyncadd (%p536_p1), %s428_s9, 4294967168  ;;  %p15_p2 = scmp.ge.s32.totalorder %s695_s24, 4   ;;  %s815_s18 = smov %s627_s19 }
 0x1cb   : > { %s816_s19 = smov %s631_s20  ;;  %s817_s20 = smov %s706_s27 }
 0x1cc   : > { %s818_s21 = smov %s695_s24  ;;  %17 = sbr.rel (!%p15_p2) target bundleno = 3 (0x3), region = 75 }
 0x1d1   :  { %433 = vsyncpa [#allocation3], 1 }
 0x1d2   :  { %435 = vsyncpa [#allocation3 + $0x1], 1 }

</bundles_post_ra>
